<compile_context>
chip_gen: v7x
topology: tpu7x:2x2x1
jax: 0.10.0
libtpu: 0.0.40
codegen_flags: <defaults>
</compile_context>

<pallas_src>
import jax
import jax.numpy as jnp
from jax.experimental import pallas as pl
from jax.experimental.pallas import tpu as pltpu


def classifier_kernel(img_ref, text_ref, w1_ref, b1_ref, w2_ref, b2_ref,
                      out_ref, x_scr):
    """One batch tile.

    img_ref/text_ref: [TM, P] f32 ; x_scr: [TM, 2P] bf16 VMEM scratch
    w1: [2P, H] bf16 ; b1: [1, H] f32 ; w2: [H, Apad] bf16 ; b2: [1, Apad] f32
    out_ref: [TM, Apad] f32
    """
    p = img_ref.shape[1]
    # torch.cat((img_f, text_f), 1) assembled directly in VMEM — img first, then
    # text — with a bf16 cast for the MXU. No wrapper-side concat/cast op.
    x_scr[:, :p] = img_ref[...].astype(jnp.bfloat16)
    x_scr[:, p:] = text_ref[...].astype(jnp.bfloat16)

    # fc: h = relu(x @ W1 + b1)  -- single K=2P MXU contraction, f32 accumulate.
    h = jnp.dot(x_scr[...], w1_ref[...], preferred_element_type=jnp.float32)
    h = jnp.maximum(h + b1_ref[...], 0.0)

    # TODO(synk): Dropout(p=0.2) is identity in eval mode; training-mode dropout
    # would use pltpu.prng_seed / pltpu.stateful_bernoulli.

    # classifier: logits = h @ W2 + b2  (W2/b2 zero-padded to Apad lanes so the
    # final store is an unmasked lane-dense vst).
    out = jnp.dot(h.astype(w2_ref.dtype), w2_ref[...],
                  preferred_element_type=jnp.float32)
    out_ref[...] = out + b2_ref[...]


def prepare_params(w1, b1, w2, b2, lane=128):
    """One-time parameter layout prep (hoisted out of the forward path).

    w1: [H, 2P] (PyTorch Linear layout), b1: [H]
    w2: [A, H],                          b2: [A]
    Returns kernel-ready params: W1 [2P, H] bf16, b1 [1, H] f32,
    W2 [H, Apad] bf16 (zero-padded), b2 [1, Apad] f32 (zero-padded).
    """
    hidden, _ = w1.shape
    a = w2.shape[0]
    a_pad = ((a + lane - 1) // lane) * lane

    w1_t = jnp.asarray(w1, jnp.float32).T.astype(jnp.bfloat16)          # [2P, H]
    b1_2d = jnp.asarray(b1, jnp.float32).reshape(1, hidden)             # [1, H]
    w2_t = jnp.asarray(w2, jnp.float32).T.astype(jnp.bfloat16)          # [H, A]
    w2_p = jnp.zeros((hidden, a_pad), jnp.bfloat16).at[:, :a].set(w2_t) # [H, Apad]
    b2_p = jnp.zeros((1, a_pad), jnp.float32).at[0, :a].set(
        jnp.asarray(b2, jnp.float32))                                   # [1, Apad]

    return {"w1": w1_t, "b1": b1_2d, "w2": w2_p, "b2": b2_p,
            "answer_space": int(a)}


def _round_up(x, m):
    return ((x + m - 1) // m) * m


def _choose_batch_tile(b):
    """Batch-tile policy:
      * B <= 32: one 16-row-aligned block (launch-latency bound anyway),
      * 32 < B <= 4096: exactly two blocks (ceil(B/2), 16-aligned) so the
        'parallel' grid axis shards across v7x's two TensorCores,
      * B > 4096: 2048-row tiles (multiple of 256) -> many pipelined steps,
        ~4.5 MiB of double-buffered per-step VMEM, well under the 32 MiB budget.
    The wrapper pads B to a multiple of the tile, so there is no `tm = B`
    fallback and no risk of a monolithic over-VMEM block.
    """
    if b <= 32:
        return _round_up(max(b, 1), 16)
    if b <= 4096:
        return _round_up(pl.cdiv(b, 2), 16)
    return 2048


def classifier_forward(text_f, img_f, params):
    """text_f, img_f: [B, P] float32.  Returns logits [B, answer_space] float32."""
    b, p = text_f.shape
    w1, b1, w2, b2 = params["w1"], params["b1"], params["w2"], params["b2"]
    a = params["answer_space"]
    k, hidden = w1.shape           # k = 2P
    a_pad = w2.shape[1]

    tm = _choose_batch_tile(b)
    b_pad = _round_up(b, tm)
    if b_pad != b:
        pad = b_pad - b
        img_f = jnp.pad(img_f, ((0, pad), (0, 0)))
        text_f = jnp.pad(text_f, ((0, pad), (0, 0)))
    grid = (b_pad // tm,)

    cost = pl.CostEstimate(
        flops=2 * b_pad * k * hidden + 2 * b_pad * hidden * a_pad,
        transcendentals=0,
        bytes_accessed=(2 * b_pad * p * 4              # img + text (f32)
                        + (k * hidden + hidden * a_pad) * 2   # bf16 weights
                        + (hidden + a_pad) * 4          # f32 biases
                        + b_pad * a_pad * 4),           # f32 logits
    )

    out_padded = pl.pallas_call(
        classifier_kernel,
        out_shape=jax.ShapeDtypeStruct((b_pad, a_pad), jnp.float32),
        grid=grid,
        in_specs=[
            pl.BlockSpec((tm, p), lambda i: (i, 0)),        # img  (tiled on batch)
            pl.BlockSpec((tm, p), lambda i: (i, 0)),        # text (tiled on batch)
            pl.BlockSpec((k, hidden), lambda i: (0, 0)),    # W1 (pinned)
            pl.BlockSpec((1, hidden), lambda i: (0, 0)),    # b1 (pinned)
            pl.BlockSpec((hidden, a_pad), lambda i: (0, 0)),  # W2 padded (pinned)
            pl.BlockSpec((1, a_pad), lambda i: (0, 0)),     # b2 padded (pinned)
        ],
        out_specs=pl.BlockSpec((tm, a_pad), lambda i: (i, 0)),
        scratch_shapes=[pltpu.VMEM((tm, k), jnp.bfloat16)],  # cat(img, text) slab
        compiler_params=pltpu.CompilerParams(
            dimension_semantics=("parallel",)),
        cost_estimate=cost,
    )(img_f, text_f, w1, b1, w2, b2)

    return out_padded[:b, :a]


if __name__ == "__main__":
    # Small shapes consistent with the module's forward.
    batch = 8
    projection_dim = 64
    hidden_dim = 128
    answer_space = 32

    key = jax.random.PRNGKey(0)
    k_text, k_img, k_w1, k_b1, k_w2, k_b2 = jax.random.split(key, 6)

    text_f = jax.random.normal(k_text, (batch, projection_dim), dtype=jnp.float32)
    img_f = jax.random.normal(k_img, (batch, projection_dim), dtype=jnp.float32)

    # Deterministic parameter init (uniform, like PyTorch Linear's default range).
    in1 = projection_dim * 2
    lim1 = 1.0 / jnp.sqrt(in1)
    w1 = jax.random.uniform(k_w1, (hidden_dim, in1), jnp.float32, -lim1, lim1)
    b1 = jax.random.uniform(k_b1, (hidden_dim,), jnp.float32, -lim1, lim1)
    lim2 = 1.0 / jnp.sqrt(hidden_dim)
    w2 = jax.random.uniform(k_w2, (answer_space, hidden_dim), jnp.float32, -lim2, lim2)
    b2 = jax.random.uniform(k_b2, (answer_space,), jnp.float32, -lim2, lim2)

    # Parameter layout prep happens ONCE here, outside the forward path.
    params = prepare_params(w1, b1, w2, b2)

    fwd = jax.jit(lambda t, i: classifier_forward(t, i, params))
    out = jax.block_until_ready(fwd(text_f, img_f))

    # Pure-JAX f32 reference (eval-mode semantics; bf16 matmul tolerance).
    # Concat order check: img first, then text, matching torch.cat((img, text), 1).
    x = jnp.concatenate([img_f, text_f], axis=1)
    ref = jnp.maximum(x @ w1.T + b1, 0.0) @ w2.T + b2
    assert out.shape == (batch, answer_space)
    assert jnp.allclose(out, ref, atol=2e-2, rtol=2e-2), \
        f"max abs err {jnp.max(jnp.abs(out - ref))}"

    print("KERNEL_OK")
</pallas_src>

<mosaic_0001>
module attributes {stable_mosaic.version = 11 : i64} {
  func.func @classifier_kernel(%arg0: i32, %arg1: memref<16x64xf32, #tpu.memory_space<vmem>>, %arg2: memref<16x64xf32, #tpu.memory_space<vmem>>, %arg3: memref<128x128xbf16, #tpu.memory_space<vmem>>, %arg4: memref<1x128xf32, #tpu.memory_space<vmem>>, %arg5: memref<128x128xbf16, #tpu.memory_space<vmem>>, %arg6: memref<1x128xf32, #tpu.memory_space<vmem>>, %arg7: memref<16x128xf32, #tpu.memory_space<vmem>>, %arg8: memref<16x128xbf16, #tpu.memory_space<vmem>>) attributes {dimension_semantics = [#tpu.dimension_semantics<parallel>], iteration_bounds = array<i64: 1>, scalar_prefetch = 0 : i64, scratch_operands = 1 : i64, tpu.core_type = #tpu.core_type<tc>, window_params = [{transform_indices = @transform_0, window_bounds = array<i64: 16, 64>}, {transform_indices = @transform_1, window_bounds = array<i64: 16, 64>}, {pipeline_mode = #tpu.pipeline_mode<synchronous>, transform_indices = @transform_2, window_bounds = array<i64: 128, 128>}, {pipeline_mode = #tpu.pipeline_mode<synchronous>, transform_indices = @transform_3, window_bounds = array<i64: 1, 128>}, {pipeline_mode = #tpu.pipeline_mode<synchronous>, transform_indices = @transform_4, window_bounds = array<i64: 128, 128>}, {pipeline_mode = #tpu.pipeline_mode<synchronous>, transform_indices = @transform_5, window_bounds = array<i64: 1, 128>}, {transform_indices = @transform_6, window_bounds = array<i64: 16, 128>}]} {
    %c0 = arith.constant 0 : index
    %c0_0 = arith.constant 0 : index
    %0 = vector.load %arg1[%c0, %c0_0] : memref<16x64xf32, #tpu.memory_space<vmem>>, vector<16x64xf32>
    %1 = arith.truncf %0 : vector<16x64xf32> to vector<16x64xbf16>
    %c0_1 = arith.constant 0 : index
    %c0_2 = arith.constant 0 : index
    %2 = vector.load %arg8[%c0_1, %c0_2] : memref<16x128xbf16, #tpu.memory_space<vmem>>, vector<16x64xbf16>
    tpu.vector_store %arg8[%c0_1, %c0_2], %1 {strides = array<i32>} : memref<16x128xbf16, #tpu.memory_space<vmem>>, vector<16x64xbf16>,
    %c0_3 = arith.constant 0 : index
    %c0_4 = arith.constant 0 : index
    %3 = vector.load %arg2[%c0_3, %c0_4] : memref<16x64xf32, #tpu.memory_space<vmem>>, vector<16x64xf32>
    %4 = arith.truncf %3 : vector<16x64xf32> to vector<16x64xbf16>
    %c0_5 = arith.constant 0 : index
    %c64 = arith.constant 64 : index
    %5 = vector.load %arg8[%c0_5, %c64] : memref<16x128xbf16, #tpu.memory_space<vmem>>, vector<16x64xbf16>
    tpu.vector_store %arg8[%c0_5, %c64], %4 {strides = array<i32>} : memref<16x128xbf16, #tpu.memory_space<vmem>>, vector<16x64xbf16>,
    %c0_6 = arith.constant 0 : index
    %c0_7 = arith.constant 0 : index
    %6 = vector.load %arg8[%c0_6, %c0_7] : memref<16x128xbf16, #tpu.memory_space<vmem>>, vector<16x128xbf16>
    %c0_8 = arith.constant 0 : index
    %c0_9 = arith.constant 0 : index
    %7 = vector.load %arg3[%c0_8, %c0_9] : memref<128x128xbf16, #tpu.memory_space<vmem>>, vector<128x128xbf16>
    %cst = arith.constant dense<0.000000e+00> : vector<16x128xf32>
    %8 = tpu.matmul %6, %7, %cst {dimension_numbers = #tpu.dot_dimension_numbers<[1], [0], [0], [1], [0, 0, 1, 1], [], []>} : vector<16x128xbf16>, vector<128x128xbf16>, vector<16x128xf32> -> vector<16x128xf32>
    %c0_10 = arith.constant 0 : index
    %c0_11 = arith.constant 0 : index
    %9 = vector.load %arg4[%c0_10, %c0_11] : memref<1x128xf32, #tpu.memory_space<vmem>>, vector<1x128xf32>
    %10 = vector.broadcast %9 : vector<1x128xf32> to vector<16x128xf32>
    %11 = arith.addf %8, %10 : vector<16x128xf32>
    %cst_12 = arith.constant 0.000000e+00 : f32
    %12 = vector.broadcast %cst_12 : f32 to vector<16x128xf32>
    %13 = arith.maximumf %11, %12 : vector<16x128xf32>
    %14 = arith.truncf %13 : vector<16x128xf32> to vector<16x128xbf16>
    %c0_13 = arith.constant 0 : index
    %c0_14 = arith.constant 0 : index
    %15 = vector.load %arg5[%c0_13, %c0_14] : memref<128x128xbf16, #tpu.memory_space<vmem>>, vector<128x128xbf16>
    %cst_15 = arith.constant dense<0.000000e+00> : vector<16x128xf32>
    %16 = tpu.matmul %14, %15, %cst_15 {dimension_numbers = #tpu.dot_dimension_numbers<[1], [0], [0], [1], [0, 0, 1, 1], [], []>} : vector<16x128xbf16>, vector<128x128xbf16>, vector<16x128xf32> -> vector<16x128xf32>
    %c0_16 = arith.constant 0 : index
    %c0_17 = arith.constant 0 : index
    %17 = vector.load %arg6[%c0_16, %c0_17] : memref<1x128xf32, #tpu.memory_space<vmem>>, vector<1x128xf32>
    %18 = vector.broadcast %17 : vector<1x128xf32> to vector<16x128xf32>
    %19 = arith.addf %16, %18 : vector<16x128xf32>
    %c0_18 = arith.constant 0 : index
    %c0_19 = arith.constant 0 : index
    %20 = vector.load %arg7[%c0_18, %c0_19] : memref<16x128xf32, #tpu.memory_space<vmem>>, vector<16x128xf32>
    tpu.vector_store %arg7[%c0_18, %c0_19], %19 {strides = array<i32>} : memref<16x128xf32, #tpu.memory_space<vmem>>, vector<16x128xf32>,
    return
  }
  func.func @transform_0(%arg0: i32) -> (i32, i32) {
    %c0_i32 = arith.constant 0 : i32
    %c0_i32_0 = arith.constant 0 : i32
    return %arg0, %c0_i32 : i32, i32
  }
  func.func @transform_1(%arg0: i32) -> (i32, i32) {
    %c0_i32 = arith.constant 0 : i32
    %c0_i32_0 = arith.constant 0 : i32
    return %arg0, %c0_i32 : i32, i32
  }
  func.func @transform_2(%arg0: i32) -> (i32, i32) {
    %c0_i32 = arith.constant 0 : i32
    %c0_i32_0 = arith.constant 0 : i32
    %c0_i32_1 = arith.constant 0 : i32
    return %c0_i32, %c0_i32_0 : i32, i32
  }
  func.func @transform_3(%arg0: i32) -> (i32, i32) {
    %c0_i32 = arith.constant 0 : i32
    %c0_i32_0 = arith.constant 0 : i32
    %c0_i32_1 = arith.constant 0 : i32
    return %c0_i32, %c0_i32_0 : i32, i32
  }
  func.func @transform_4(%arg0: i32) -> (i32, i32) {
    %c0_i32 = arith.constant 0 : i32
    %c0_i32_0 = arith.constant 0 : i32
    %c0_i32_1 = arith.constant 0 : i32
    return %c0_i32, %c0_i32_0 : i32, i32
  }
  func.func @transform_5(%arg0: i32) -> (i32, i32) {
    %c0_i32 = arith.constant 0 : i32
    %c0_i32_0 = arith.constant 0 : i32
    %c0_i32_1 = arith.constant 0 : i32
    return %c0_i32, %c0_i32_0 : i32, i32
  }
  func.func @transform_6(%arg0: i32) -> (i32, i32) {
    %c0_i32 = arith.constant 0 : i32
    %c0_i32_0 = arith.constant 0 : i32
    return %arg0, %c0_i32 : i32, i32
  }
}

</mosaic_0001>

<bundles_post_ra>
// kernel: _lambda_.1
= control target key start
LH: loop header
LB: loop body
LE: loop exit
PB: predicated region body
PF: predicated region fallthrough
CT: control target
= control target key end

     0   :  { %11 = vsyncpa [#allocation4], 0  ;;  %s408_s21 = smov [#allocation3]   ;;  %s508_s0 = inlined_call_operand.vmem [shape: f32[16,64], index: 0, kind: input, shape index: {}]   ;;  %s509_s1 = inlined_call_operand.vmem [shape: f32[16,64], index: 1, kind: input, shape index: {}]   ;;  %s510_s2 = inlined_call_operand.hbm [shape: bf16[128,128], index: 2, kind: input, shape index: {}]   ;;  %s511_s3 = inlined_call_operand.vmem [shape: f32[1,128], index: 3, kind: input, shape index: {}]   ;;  %s512_s4 = inlined_call_operand.vmem [shape: bf16[128,128], index: 4, kind: input, shape index: {}]   ;;  %s513_s5 = inlined_call_operand.vmem [shape: f32[1,128], index: 5, kind: input, shape index: {}]   ;;  %s514_s6 = inlined_call_operand.vmem [shape: f32[16,128], index: 6, kind: output, shape index: {}]  }
   0x1   :  { %s21_s22 = sshll.u32 %s408_s21, 4  ;;  %s384_s25 = scalar_lea.hbm %s510_s2, 1024  ;;  %s22_s22 = int_to_ptr.vmem [resolvable:$true] %s21_s22 }
   0x2   :  { %p385_p0 = scmp.ne.s32.totalorder %s510_s2, %s384_s25  ;;  %p388_p1 = scmp.lt.u32.totalorder %s384_s25, %s510_s2 }
   0x4   :  { %p390_p2 = pnand %p388_p1, %p385_p0 }
   0x6   :  { %393 = shalt.err (!%p390_p2)
}
   0x7   :  { %s394_s30 = scalar_lea.vmem %s22_s22, 1024  ;;  %p399_p4 = scmp.lt.s32.totalorder %s22_s22, %s22_s22 }
   0x8   :  { %p395_p3 = scmp.ne.s32.totalorder %s22_s22, %s394_s30  ;;  %p400_p5 = scmp.lt.s32.totalorder %s394_s30, %s394_s30 }
   0xa   :  { %p401_p6 = por %p400_p5, %p399_p4 }
   0xc   :  { %p402_p7 = pnand %p401_p6, %p395_p3 }
   0xe   :  { %405 = shalt.err (!%p402_p7)
}
   0xf   :  { %s409_s7 = smov 64   ;;  %s410_s8 = smov 4  }
  0x10   :  { %27 = dma.hbm_to_vmem [thread:$0]  %s510_s2, 1024, %s22_s22, [#allocation4], %s409_s7, %s409_s7, %s410_s8  }
  0x11   :  { %406 = dma.done.wait [#allocation4], 1024  }
  0x12   :  { %407 = vsyncadd [#allocation4], 4294966272  ;;  %v411_v0 = vmov 0.0   ;;  %vm412_vm0 = vmmov 0   ;;  %v43_v1 = vld [vmem:[%s509_s1] sm:$0xff]  ;;  %v44_v2 = vld [vmem:[%s509_s1 + $0x8] sm:$0xff] }
  0x13   :  { %323 = vmatprep.subr.bf16.mxu0 %v411_v0  ;;  %339 = vmatprep.mubr.msk.bf16.mxu0 %vm412_vm0, %v411_v0  ;;  %v45_v3 = vpack.c.bf16 %v44_v2, %v43_v1  ;;  %v368_v4 = vld [vmem:[#allocation3] sm:$0xff]   ;;  %v369_v5 = vld [vmem:[#allocation3 + $0x8] sm:$0xff]   ;;  %v370_v6 = vld [vmem:[#allocation3 + $0x10] sm:$0xff]   ;;  %vm41_vm1 = vcmask 523264   ;;  %vm50_vm2 = vcmask 1048064  }
  0x14   :  { %343 = vmatprep.subr.bf16.mxu1 %v411_v0  ;;  %359 = vmatprep.mubr.msk.bf16.mxu1 %vm412_vm0, %v411_v0  ;;  %v38_v7 = vld [vmem:[%s508_s0] sm:$0xff]  ;;  %v39_v8 = vld [vmem:[%s508_s0 + $0x8] sm:$0xff]  ;;  %v378_v14 = vld [vmem:[%s512_s4 + $0x10] sm:$0xff]  }
  0x15   :  { %47 = vrot.lane.b32.xlu0 %v45_v3, %s409_s7  ;;  %324 = vmatpush3.bf16.msra.mxu0 %v368_v4  ;;  %v40_v9 = vpack.c.bf16 %v39_v8, %v38_v7  ;;  %v376_v10 = vld [vmem:[%s512_s4] sm:$0xff]   ;;  %v377_v12 = vld [vmem:[%s512_s4 + $0x8] sm:$0xff]   ;;  %v373_v15 = vld [vmem:[#allocation3 + $0x28] sm:$0xff]  }
  0x16   :  { %325 = vmatprep.subr.bf16.mxu0 %v411_v0  ;;  %v371_v11 = vld [vmem:[#allocation3 + $0x18] sm:$0xff]   ;;  %344 = vmatpush3.bf16.msra.mxu1 %v376_v10  ;;  %v372_v13 = vld [vmem:[#allocation3 + $0x20] sm:$0xff]   ;;  %v379_v16 = vld [vmem:[%s512_s4 + $0x18] sm:$0xff]  }
  0x17   :  { %42 = vst.msk [vmem:[#allocation2] sm:$0xff] %vm41_vm1, %v40_v9  ;;  %345 = vmatprep.subr.bf16.mxu1 %v411_v0  ;;  %v374_v17 = vld [vmem:[#allocation3 + $0x30] sm:$0xff]   ;;  %v380_v18 = vld [vmem:[%s512_s4 + $0x20] sm:$0xff]   ;;  %v381_v20 = vld [vmem:[%s512_s4 + $0x28] sm:$0xff]  }
  0x18   :  { %v375_v19 = vld [vmem:[#allocation3 + $0x38] sm:$0xff]   ;;  %v382_v23 = vld [vmem:[%s512_s4 + $0x30] sm:$0xff]   ;;  %v383_v24 = vld [vmem:[%s512_s4 + $0x38] sm:$0xff]  }
  0x19   :  { %326 = vmatpush3.bf16.msra.mxu0 %v369_v5  ;;  %v287_v25 = vld [vmem:[%s511_s3] ss:$0 sm:$0xff] }
  0x1a   :  { %327 = vmatprep.subr.bf16.mxu0 %v411_v0  ;;  %346 = vmatpush3.bf16.msra.mxu1 %v377_v12  ;;  %v296_v35 = vld [vmem:[%s513_s5] ss:$0 sm:$0xff] }
  0x1b   :  { %347 = vmatprep.subr.bf16.mxu1 %v411_v0 }
  0x1d   :  { %328 = vmatpush3.bf16.msra.mxu0 %v370_v6 }
  0x1e   :  { %329 = vmatprep.subr.bf16.mxu0 %v411_v0  ;;  %348 = vmatpush3.bf16.msra.mxu1 %v378_v14 }
  0x1f   :  { %349 = vmatprep.subr.bf16.mxu1 %v411_v0 }
  0x21   :  { %330 = vmatpush3.bf16.msra.mxu0 %v371_v11 }
  0x22   :  { %331 = vmatprep.subr.bf16.mxu0 %v411_v0  ;;  %350 = vmatpush3.bf16.msra.mxu1 %v379_v16 }
  0x23   :  { %351 = vmatprep.subr.bf16.mxu1 %v411_v0 }
  0x25   :  { %332 = vmatpush3.bf16.msra.mxu0 %v372_v13 }
  0x26   :  { %333 = vmatprep.subr.bf16.mxu0 %v411_v0  ;;  %352 = vmatpush3.bf16.msra.mxu1 %v380_v18 }
  0x27   :  { %353 = vmatprep.subr.bf16.mxu1 %v411_v0 }
  0x29   :  { %334 = vmatpush3.bf16.msra.mxu0 %v373_v15 }
  0x2a   :  { %335 = vmatprep.subr.bf16.mxu0 %v411_v0  ;;  %354 = vmatpush3.bf16.msra.mxu1 %v381_v20 }
  0x2b   :  { %355 = vmatprep.subr.bf16.mxu1 %v411_v0 }
  0x2d   :  { %336 = vmatpush3.bf16.msra.mxu0 %v374_v17 }
  0x2e   :  { %337 = vmatprep.subr.bf16.mxu0 %v411_v0  ;;  %356 = vmatpush3.bf16.msra.mxu1 %v382_v23 }
  0x2f   :  { %357 = vmatprep.subr.bf16.mxu1 %v411_v0 }
  0x31   :  { %338 = vmatpush3.bf16.msra.mxu0 %v375_v19 }
  0x32   :  { %358 = vmatpush3.bf16.msra.mxu1 %v383_v24 }
  0x87   :  { %v48_v21 = vpop.permute.xlu0 %47 }
  0x88   :  { %51 = vst.msk [vmem:[#allocation2] sm:$0xff] %vm50_vm2, %v48_v21 }
  0x8f   :  { %v52_v22 = vld [vmem:[#allocation2] sm:$0xff] }
  0x90   :  { %340 = vmatmul.mubr.bf16.vlgmr.msra.gmra.mrb[0].mxu0 %v52_v22 }
 0x163   :  { %v158_v26 = vpop.f32.mrb[0].mxu0 }
 0x164   :  { %v159_v27 = vadd.f32 %v287_v25, %v158_v26  ;;  %v341_v28 = vpop.f32.mrb[1].mxu0 }
 0x165   :  { %v161_v29 = vpop.f32.mrb[2].mxu0 }
 0x166   :  { %v162_v30 = vadd.f32 %v287_v25, %v161_v29  ;;  %v342_v31 = vpop.f32.mrb[3].mxu0  ;;  %v165_v32 = vmax.f32 %v159_v27, 0.0 }
 0x168   :  { %v166_v33 = vmax.f32 %v162_v30, 0.0 }
 0x16a   :  { %v167_v34 = vpack.c.bf16 %v166_v33, %v165_v32 }
 0x16c   :  { %360 = vmatmul.mubr.bf16.vlgmr.msra.gmra.mrb[0].mxu1 %v167_v34 }
 0x23f   :  { %v273_v36 = vpop.f32.mrb[0].mxu1 }
 0x240   :  { %v274_v37 = vadd.f32 %v296_v35, %v273_v36  ;;  %v361_v38 = vpop.f32.mrb[1].mxu1 }
 0x241   :  { %v276_v39 = vpop.f32.mrb[2].mxu1 }
 0x242   :  { %280 = vst [vmem:[%s514_s6] sm:$0xff] %v274_v37  ;;  %v277_v40 = vadd.f32 %v296_v35, %v276_v39  ;;  %v362_v41 = vpop.f32.mrb[3].mxu1 }
 0x244   :  { %281 = vst [vmem:[%s514_s6 + $0x8] sm:$0xff] %v277_v40 }
 0x245   :  { %286 = vsyncpa [#allocation4], 1 }

</bundles_post_ra>
